<compile_context>
chip_gen: v7x
topology: tpu7x:2x2x1
jax: 0.10.0
libtpu: 0.0.40
codegen_flags: <defaults>
</compile_context>

<pallas_src>
import jax
import jax.numpy as jnp
from jax.experimental import pallas as pl
from jax.experimental.pallas import tpu as pltpu


def _round_up(x, m):
    return (x + m - 1) // m * m


def res_gcn_kernel(x_ref, adj_ref,
                   w1_ref, b1_ref, w2_ref, b2_ref, w3_ref, b3_ref,
                   o_ref):
    """One grid step = `bs` batch elements.

    x_ref:   (bs, N, in_dim)   VMEM f32
    adj_ref: (bs, N, N)        VMEM f32
    w*_ref:  (d_in, out_pad)   VMEM bf16, grid-invariant
    b*_ref:  (1, out_pad)      VMEM f32,  grid-invariant
    o_ref:   (bs, N, out_pad)  VMEM f32
    """
    bs, n, _ = x_ref.shape
    # adj is reused by all three layers: cast once per grid step to a bf16
    # MXU operand; accumulation below stays f32.
    a = adj_ref[...].astype(jnp.bfloat16)                  # (bs, N, N)

    def layer(h, w_ref, b_ref):
        # y = adj @ h + h   (aggregation on the MXU, residual added in f32)
        y = jnp.einsum("bij,bjd->bid", a, h.astype(jnp.bfloat16),
                       preferred_element_type=jnp.float32) + h
        # y = y @ W + b, flattened so the MXU sees one tall (bs*N, d) matmul.
        d = y.shape[-1]
        y2 = jnp.dot(y.reshape(bs * n, d).astype(jnp.bfloat16), w_ref[...],
                     preferred_element_type=jnp.float32) + b_ref[...]
        return y2.reshape(bs, n, y2.shape[-1])

    h = layer(x_ref[...], w1_ref, b1_ref)
    h = layer(h, w2_ref, b2_ref)
    h = layer(h, w3_ref, b3_ref)
    o_ref[...] = h.astype(o_ref.dtype)


def res_gcn(inputs, adj, params, *, target_rows=2048):
    """inputs: (B, N, in_dim) f32, adj: (B, N, N) f32 -> (B, N, out_dim) f32."""
    B, N, in_dim = inputs.shape
    w1, b1, w2, b2, w3, b3 = params
    out_dim = w1.shape[1]
    out_pad = _round_up(out_dim, 128)         # lane-dense feature dim
    n_pad = _round_up(N, 8)                   # sublane-dense node dim

    f32, bf16 = jnp.float32, jnp.bfloat16
    inputs = inputs.astype(f32)
    adj = adj.astype(f32)
    if n_pad != N:
        # Zero rows/cols: padded rows never contaminate real rows (their adj
        # columns are zero) and are sliced away after the kernel.
        inputs = jnp.pad(inputs, ((0, 0), (0, n_pad - N), (0, 0)))
        adj = jnp.pad(adj, ((0, 0), (0, n_pad - N), (0, n_pad - N)))

    def pad2(m, r, c):
        return jnp.pad(m.astype(f32), ((0, r - m.shape[0]), (0, c - m.shape[1])))

    # Weights stored bf16 (halves grid-invariant VMEM/DMA); biases stay f32.
    w1p = pad2(w1, in_dim, out_pad).astype(bf16)
    w2p = pad2(w2, out_pad, out_pad).astype(bf16)
    w3p = pad2(w3, out_pad, out_pad).astype(bf16)
    b1p = pad2(b1.reshape(1, -1), 1, out_pad)
    b2p = pad2(b2.reshape(1, -1), 1, out_pad)
    b3p = pad2(b3.reshape(1, -1), 1, out_pad)

    # --- generation-aware VMEM budgeting -----------------------------------
    vmem_cap = 64 * 1024 * 1024               # conservative fallback (v7x/TC)
    try:
        vmem_cap = int(pltpu.get_tpu_info().vmem_capacity_bytes)
    except Exception:
        pass
    vmem_limit_cap = int(0.75 * vmem_cap)     # ~48 MiB v7x, ~96 MiB v5e/v6e
    adj_block_cap = vmem_cap // 6             # ~11 MiB v7x, ~21 MiB v5e/v6e

    def block_working_set(bs):
        # double-buffered f32 I/O blocks (x, adj, out)
        io = 2 * 4 * bs * n_pad * (in_dim + n_pad + out_pad)
        # grid-invariant params (double-buffered): bf16 weights + f32 biases
        w = 2 * (2 * (in_dim * out_pad + 2 * out_pad * out_pad) + 4 * 3 * out_pad)
        # live in-kernel temporaries: bf16 adj copy + ~4 f32 (bs*N, out_pad)
        live = 2 * bs * n_pad * n_pad + 4 * 4 * bs * n_pad * out_pad
        return io + w + live

    def fits(bs):
        return int(1.25 * block_working_set(bs)) <= vmem_limit_cap

    # --- choose batch-pack size bs ------------------------------------------
    bs = max(1, min(B, target_rows // max(n_pad, 1)))
    if B >= 2:
        bs = min(bs, B // 2)   # grid >= 2 steps -> both v7x TensorCores busy
    while bs > 1 and (4 * bs * n_pad * n_pad > adj_block_cap or not fits(bs)):
        bs -= 1
    while B % bs:
        bs -= 1
    if not fits(bs):
        # TODO(synk): adj row-tiling / streamed contraction needed for this N.
        raise ValueError(
            "ResGCN single-batch block does not fit the VMEM budget; "
            "adj tiling/streaming is required for this N.")
    grid = (B // bs,)

    vmem_limit = int(min(max(int(1.5 * block_working_set(bs)),
                             32 * 1024 * 1024),
                         vmem_limit_cap))

    const = lambda shape: pl.BlockSpec(shape, lambda i: tuple(0 for _ in shape))

    out_padded = pl.pallas_call(
        res_gcn_kernel,
        out_shape=jax.ShapeDtypeStruct((B, n_pad, out_pad), jnp.float32),
        grid_spec=pltpu.PrefetchScalarGridSpec(
            num_scalar_prefetch=0,
            grid=grid,
            in_specs=[
                pl.BlockSpec((bs, n_pad, in_dim), lambda i: (i, 0, 0)),   # x
                pl.BlockSpec((bs, n_pad, n_pad),  lambda i: (i, 0, 0)),   # adj
                const((in_dim, out_pad)),  const((1, out_pad)),           # W1, b1
                const((out_pad, out_pad)), const((1, out_pad)),           # W2, b2
                const((out_pad, out_pad)), const((1, out_pad)),           # W3, b3
            ],
            out_specs=pl.BlockSpec((bs, n_pad, out_pad), lambda i: (i, 0, 0)),
        ),
        compiler_params=pltpu.CompilerParams(
            dimension_semantics=("parallel",),
            vmem_limit_bytes=vmem_limit),
    )(inputs, adj, w1p, b1p, w2p, b2p, w3p, b3p)

    # Strip node / lane padding back to the true output shape.
    return out_padded[:, :N, :out_dim]


def init_params(key, in_dim, out_dim):
    """Match GraphConv.init_weights: xavier_uniform_ weights, zero bias.

    Weights are (fan_in, fan_out), used directly as y @ W (same as torch).
    """
    ks = jax.random.split(key, 3)

    def xavier(k, fi, fo):
        bound = (6.0 / (fi + fo)) ** 0.5
        return jax.random.uniform(k, (fi, fo), jnp.float32, -bound, bound)

    w1 = xavier(ks[0], in_dim, out_dim)
    w2 = xavier(ks[1], out_dim, out_dim)
    w3 = xavier(ks[2], out_dim, out_dim)
    zb = lambda: jnp.zeros((out_dim,), jnp.float32)
    return (w1, zb(), w2, zb(), w3, zb())


def res_gcn_ref(inputs, adj, params):
    """Pure-JAX f32 reference mirroring the PyTorch ResGCN forward."""
    w1, b1, w2, b2, w3, b3 = params

    def layer(h, w, b):
        y = jnp.einsum("bij,bjd->bid", adj, h) + h     # adj @ h, then add_self
        return y @ w + b

    h = layer(inputs, w1, b1)
    h = layer(h, w2, b2)
    h = layer(h, w3, b3)
    return h


if __name__ == "__main__":
    B, N, in_dim, out_dim = 2, 8, 16, 32

    key = jax.random.PRNGKey(0)
    k_x, k_a, k_p = jax.random.split(key, 3)

    inputs = jax.random.normal(k_x, (B, N, in_dim), dtype=jnp.float32)
    # row-normalized random adjacency (GCN-style propagation matrix)
    adj_raw = jax.random.uniform(k_a, (B, N, N), dtype=jnp.float32)
    adj = adj_raw / jnp.sum(adj_raw, axis=-1, keepdims=True)

    params = init_params(k_p, in_dim, out_dim)

    out = jax.block_until_ready(res_gcn(inputs, adj, params))
    ref = res_gcn_ref(inputs, adj, params)

    assert out.shape == (B, N, out_dim)
    # bf16 MXU operands with f32 accumulation -> relaxed tolerance vs f32 ref.
    assert jnp.allclose(out, ref, atol=5e-2, rtol=5e-2), (
        float(jnp.max(jnp.abs(out - ref))))

    print("KERNEL_OK")
</pallas_src>

<mosaic_0001>
module attributes {stable_mosaic.version = 11 : i64} {
  func.func @res_gcn_kernel(%arg0: i32, %arg1: memref<1x8x16xf32, #tpu.memory_space<vmem>>, %arg2: memref<1x8x8xf32, #tpu.memory_space<vmem>>, %arg3: memref<16x128xbf16, #tpu.memory_space<vmem>>, %arg4: memref<1x128xf32, #tpu.memory_space<vmem>>, %arg5: memref<128x128xbf16, #tpu.memory_space<vmem>>, %arg6: memref<1x128xf32, #tpu.memory_space<vmem>>, %arg7: memref<128x128xbf16, #tpu.memory_space<vmem>>, %arg8: memref<1x128xf32, #tpu.memory_space<vmem>>, %arg9: memref<1x8x128xf32, #tpu.memory_space<vmem>>) attributes {dimension_semantics = [#tpu.dimension_semantics<parallel>], iteration_bounds = array<i64: 2>, scalar_prefetch = 0 : i64, scratch_operands = 0 : i64, tpu.core_type = #tpu.core_type<tc>, window_params = [{transform_indices = @transform_0, window_bounds = array<i64: 1, 8, 16>}, {transform_indices = @transform_1, window_bounds = array<i64: 1, 8, 8>}, {pipeline_mode = #tpu.pipeline_mode<synchronous>, transform_indices = @transform_2, window_bounds = array<i64: 16, 128>}, {pipeline_mode = #tpu.pipeline_mode<synchronous>, transform_indices = @transform_3, window_bounds = array<i64: 1, 128>}, {pipeline_mode = #tpu.pipeline_mode<synchronous>, transform_indices = @transform_4, window_bounds = array<i64: 128, 128>}, {pipeline_mode = #tpu.pipeline_mode<synchronous>, transform_indices = @transform_5, window_bounds = array<i64: 1, 128>}, {pipeline_mode = #tpu.pipeline_mode<synchronous>, transform_indices = @transform_6, window_bounds = array<i64: 128, 128>}, {pipeline_mode = #tpu.pipeline_mode<synchronous>, transform_indices = @transform_7, window_bounds = array<i64: 1, 128>}, {transform_indices = @transform_8, window_bounds = array<i64: 1, 8, 128>}]} {
    %c0 = arith.constant 0 : index
    %c0_0 = arith.constant 0 : index
    %c0_1 = arith.constant 0 : index
    %0 = vector.load %arg2[%c0, %c0_0, %c0_1] : memref<1x8x8xf32, #tpu.memory_space<vmem>>, vector<1x8x8xf32>
    %1 = arith.truncf %0 : vector<1x8x8xf32> to vector<1x8x8xbf16>
    %c0_2 = arith.constant 0 : index
    %c0_3 = arith.constant 0 : index
    %c0_4 = arith.constant 0 : index
    %2 = vector.load %arg1[%c0_2, %c0_3, %c0_4] : memref<1x8x16xf32, #tpu.memory_space<vmem>>, vector<1x8x16xf32>
    %3 = arith.truncf %2 : vector<1x8x16xf32> to vector<1x8x16xbf16>
    "tpu.trace_start"() <{level = 10 : i32, message = "bij,bjd->bid"}> : () -> ()
    %cst = arith.constant dense<0.000000e+00> : vector<1x8x16xf32>
    %4 = tpu.matmul %1, %3, %cst {dimension_numbers = #tpu.dot_dimension_numbers<[2], [1], [1], [2], [0, 0, 0, 1, 1, 2], [0], [0]>} : vector<1x8x8xbf16>, vector<1x8x16xbf16>, vector<1x8x16xf32> -> vector<1x8x16xf32>
    "tpu.trace_stop"() : () -> ()
    %5 = arith.addf %4, %2 : vector<1x8x16xf32>
    %6 = vector.shape_cast %5 : vector<1x8x16xf32> to vector<8x16xf32>
    %7 = arith.truncf %6 : vector<8x16xf32> to vector<8x16xbf16>
    %c0_5 = arith.constant 0 : index
    %c0_6 = arith.constant 0 : index
    %8 = vector.load %arg3[%c0_5, %c0_6] : memref<16x128xbf16, #tpu.memory_space<vmem>>, vector<16x128xbf16>
    %cst_7 = arith.constant dense<0.000000e+00> : vector<8x128xf32>
    %9 = tpu.matmul %7, %8, %cst_7 {dimension_numbers = #tpu.dot_dimension_numbers<[1], [0], [0], [1], [0, 0, 1, 1], [], []>} : vector<8x16xbf16>, vector<16x128xbf16>, vector<8x128xf32> -> vector<8x128xf32>
    %c0_8 = arith.constant 0 : index
    %c0_9 = arith.constant 0 : index
    %10 = vector.load %arg4[%c0_8, %c0_9] : memref<1x128xf32, #tpu.memory_space<vmem>>, vector<1x128xf32>
    %11 = vector.broadcast %10 : vector<1x128xf32> to vector<8x128xf32>
    %12 = arith.addf %9, %11 : vector<8x128xf32>
    %13 = vector.shape_cast %12 : vector<8x128xf32> to vector<1x8x128xf32>
    %14 = arith.truncf %13 : vector<1x8x128xf32> to vector<1x8x128xbf16>
    "tpu.trace_start"() <{level = 10 : i32, message = "bij,bjd->bid"}> : () -> ()
    %cst_10 = arith.constant dense<0.000000e+00> : vector<1x8x128xf32>
    %15 = tpu.matmul %1, %14, %cst_10 {dimension_numbers = #tpu.dot_dimension_numbers<[2], [1], [1], [2], [0, 0, 0, 1, 1, 2], [0], [0]>} : vector<1x8x8xbf16>, vector<1x8x128xbf16>, vector<1x8x128xf32> -> vector<1x8x128xf32>
    "tpu.trace_stop"() : () -> ()
    %16 = arith.addf %15, %13 : vector<1x8x128xf32>
    %17 = vector.shape_cast %16 : vector<1x8x128xf32> to vector<8x128xf32>
    %18 = arith.truncf %17 : vector<8x128xf32> to vector<8x128xbf16>
    %c0_11 = arith.constant 0 : index
    %c0_12 = arith.constant 0 : index
    %19 = vector.load %arg5[%c0_11, %c0_12] : memref<128x128xbf16, #tpu.memory_space<vmem>>, vector<128x128xbf16>
    %cst_13 = arith.constant dense<0.000000e+00> : vector<8x128xf32>
    %20 = tpu.matmul %18, %19, %cst_13 {dimension_numbers = #tpu.dot_dimension_numbers<[1], [0], [0], [1], [0, 0, 1, 1], [], []>} : vector<8x128xbf16>, vector<128x128xbf16>, vector<8x128xf32> -> vector<8x128xf32>
    %c0_14 = arith.constant 0 : index
    %c0_15 = arith.constant 0 : index
    %21 = vector.load %arg6[%c0_14, %c0_15] : memref<1x128xf32, #tpu.memory_space<vmem>>, vector<1x128xf32>
    %22 = vector.broadcast %21 : vector<1x128xf32> to vector<8x128xf32>
    %23 = arith.addf %20, %22 : vector<8x128xf32>
    %24 = vector.shape_cast %23 : vector<8x128xf32> to vector<1x8x128xf32>
    %25 = arith.truncf %24 : vector<1x8x128xf32> to vector<1x8x128xbf16>
    "tpu.trace_start"() <{level = 10 : i32, message = "bij,bjd->bid"}> : () -> ()
    %cst_16 = arith.constant dense<0.000000e+00> : vector<1x8x128xf32>
    %26 = tpu.matmul %1, %25, %cst_16 {dimension_numbers = #tpu.dot_dimension_numbers<[2], [1], [1], [2], [0, 0, 0, 1, 1, 2], [0], [0]>} : vector<1x8x8xbf16>, vector<1x8x128xbf16>, vector<1x8x128xf32> -> vector<1x8x128xf32>
    "tpu.trace_stop"() : () -> ()
    %27 = arith.addf %26, %24 : vector<1x8x128xf32>
    %28 = vector.shape_cast %27 : vector<1x8x128xf32> to vector<8x128xf32>
    %29 = arith.truncf %28 : vector<8x128xf32> to vector<8x128xbf16>
    %c0_17 = arith.constant 0 : index
    %c0_18 = arith.constant 0 : index
    %30 = vector.load %arg7[%c0_17, %c0_18] : memref<128x128xbf16, #tpu.memory_space<vmem>>, vector<128x128xbf16>
    %cst_19 = arith.constant dense<0.000000e+00> : vector<8x128xf32>
    %31 = tpu.matmul %29, %30, %cst_19 {dimension_numbers = #tpu.dot_dimension_numbers<[1], [0], [0], [1], [0, 0, 1, 1], [], []>} : vector<8x128xbf16>, vector<128x128xbf16>, vector<8x128xf32> -> vector<8x128xf32>
    %c0_20 = arith.constant 0 : index
    %c0_21 = arith.constant 0 : index
    %32 = vector.load %arg8[%c0_20, %c0_21] : memref<1x128xf32, #tpu.memory_space<vmem>>, vector<1x128xf32>
    %33 = vector.broadcast %32 : vector<1x128xf32> to vector<8x128xf32>
    %34 = arith.addf %31, %33 : vector<8x128xf32>
    %35 = vector.shape_cast %34 : vector<8x128xf32> to vector<1x8x128xf32>
    %c0_22 = arith.constant 0 : index
    %c0_23 = arith.constant 0 : index
    %c0_24 = arith.constant 0 : index
    %36 = vector.load %arg9[%c0_22, %c0_23, %c0_24] : memref<1x8x128xf32, #tpu.memory_space<vmem>>, vector<1x8x128xf32>
    tpu.vector_store %arg9[%c0_22, %c0_23, %c0_24], %35 {strides = array<i32>} : memref<1x8x128xf32, #tpu.memory_space<vmem>>, vector<1x8x128xf32>,
    return
  }
  func.func @transform_0(%arg0: i32) -> (i32, i32, i32) {
    %c0_i32 = arith.constant 0 : i32
    %c0_i32_0 = arith.constant 0 : i32
    %c0_i32_1 = arith.constant 0 : i32
    return %arg0, %c0_i32, %c0_i32_0 : i32, i32, i32
  }
  func.func @transform_1(%arg0: i32) -> (i32, i32, i32) {
    %c0_i32 = arith.constant 0 : i32
    %c0_i32_0 = arith.constant 0 : i32
    %c0_i32_1 = arith.constant 0 : i32
    return %arg0, %c0_i32, %c0_i32_0 : i32, i32, i32
  }
  func.func @transform_2(%arg0: i32) -> (i32, i32) {
    %c0_i32 = arith.constant 0 : i32
    %c0_i32_0 = arith.constant 0 : i32
    %c0_i32_1 = arith.constant 0 : i32
    return %c0_i32, %c0_i32_0 : i32, i32
  }
  func.func @transform_3(%arg0: i32) -> (i32, i32) {
    %c0_i32 = arith.constant 0 : i32
    %c0_i32_0 = arith.constant 0 : i32
    %c0_i32_1 = arith.constant 0 : i32
    return %c0_i32, %c0_i32_0 : i32, i32
  }
  func.func @transform_4(%arg0: i32) -> (i32, i32) {
    %c0_i32 = arith.constant 0 : i32
    %c0_i32_0 = arith.constant 0 : i32
    %c0_i32_1 = arith.constant 0 : i32
    return %c0_i32, %c0_i32_0 : i32, i32
  }
  func.func @transform_5(%arg0: i32) -> (i32, i32) {
    %c0_i32 = arith.constant 0 : i32
    %c0_i32_0 = arith.constant 0 : i32
    %c0_i32_1 = arith.constant 0 : i32
    return %c0_i32, %c0_i32_0 : i32, i32
  }
  func.func @transform_6(%arg0: i32) -> (i32, i32) {
    %c0_i32 = arith.constant 0 : i32
    %c0_i32_0 = arith.constant 0 : i32
    %c0_i32_1 = arith.constant 0 : i32
    return %c0_i32, %c0_i32_0 : i32, i32
  }
  func.func @transform_7(%arg0: i32) -> (i32, i32) {
    %c0_i32 = arith.constant 0 : i32
    %c0_i32_0 = arith.constant 0 : i32
    %c0_i32_1 = arith.constant 0 : i32
    return %c0_i32, %c0_i32_0 : i32, i32
  }
  func.func @transform_8(%arg0: i32) -> (i32, i32, i32) {
    %c0_i32 = arith.constant 0 : i32
    %c0_i32_0 = arith.constant 0 : i32
    %c0_i32_1 = arith.constant 0 : i32
    return %arg0, %c0_i32, %c0_i32_0 : i32, i32, i32
  }
}

</mosaic_0001>

<bundles_post_ra>
// kernel: tpu_custom_call.1
= control target key start
LH: loop header
LB: loop body
LE: loop exit
PB: predicated region body
PF: predicated region fallthrough
CT: control target
= control target key end

     0   :  { %s1833_s0 = inlined_call_operand.hbm [shape: f32[2,8,16], index: 0, kind: input, shape index: {}]   ;;  %s1834_s1 = inlined_call_operand.hbm [shape: f32[2,8,8], index: 1, kind: input, shape index: {}]   ;;  %s1835_s2 = inlined_call_operand.hbm [shape: bf16[16,128], index: 2, kind: input, shape index: {}]   ;;  %s1836_s3 = inlined_call_operand.vmem [shape: f32[1,128], index: 3, kind: input, shape index: {}]   ;;  %s1837_s4 = inlined_call_operand.hbm [shape: bf16[128,128], index: 4, kind: input, shape index: {}]   ;;  %s1838_s5 = inlined_call_operand.vmem [shape: f32[1,128], index: 5, kind: input, shape index: {}]   ;;  %s1839_s6 = inlined_call_operand.hbm [shape: bf16[128,128], index: 6, kind: input, shape index: {}]   ;;  %s1840_s7 = inlined_call_operand.vmem [shape: f32[1,128], index: 7, kind: input, shape index: {}]   ;;  %s1841_s8 = inlined_call_operand.hbm [shape: f32[2,8,128], index: 8, kind: output, shape index: {}]  }
   0x1   :  { %1848 = sst [smem:[#allocation19_spill]] %s1835_s2 }
   0x2   :  { %1849 = sst [smem:[#allocation20_spill]] %s1837_s4 }
   0x3   :  { %1850 = sst [smem:[#allocation21_spill]] %s1839_s6 }
   0x4   :  { %13 = vsyncpa [#allocation3], 0 }
   0x5   :  { %15 = vsyncpa [#allocation3 + $0x1], 0 }
   0x6   :  { %16 = vsyncpa [#allocation6], 0 }
   0x7   :  { %18 = vsyncpa [#allocation6 + $0x1], 0 }
   0x8   :  { %19 = vsyncpa [#allocation9], 0 }
   0x9   :  { %20 = vsyncpa [#allocation4], 0 }
   0xa   :  { %22 = vsyncpa [#allocation4 + $0x1], 0  ;;  %s1479_s27 = smov 0   ;;  %s1481_s28 = smov 0  }
   0xb   :  { %s1483_s29 = smov 0   ;;  %s1485_s30 = smov 0  }
   0xc LB: > { %1851 = sst [smem:[#allocation17_spill]] %s1410_s27  ;;  %s1500_s9 = sadd.s32 4294967295, %s1422_s30   ;;  %s1422_s30 = sphi %s1485_s30, %s1878_s30   ;;  %s1418_s29 = sphi %s1483_s29, %s1877_s29   ;;  %s1414_s28 = sphi %s1481_s28, %s1876_s28   ;;  %s1410_s27 = sphi %s1479_s27, %s1875_s27  }
   0xd   : > { %s962_s10 = sadd.s32 4294967294, %s1422_s30   ;;  %p48_p0 = scmp.ne.s32.totalorder %s1414_s28, %s1410_s27 }
   0xe   : > { %p1842_p1 = scmp.eq.s32.totalorder %s1500_s9, 0  ;;  %p230_p3 = scmp.eq.s32.totalorder %s962_s10, 1 }
   0xf   : > { %p963_p5 = scmp.ge.s32.totalorder %s1422_s30, 1  ;;  %p237_p7 = scmp.lt.s32.totalorder %s1422_s30, 3 }
  0x10   : > { %p1509_p4 = por %p1842_p1, %p48_p0  ;;  %p1514_p6 = por %p230_p3, %p48_p0 }
  0x11   : > { %p1519_p8 = pnand %p963_p5, %p237_p7  ;;  %s1424_s14 = smov [#allocation7]  }
  0x12   : > { %s1852_s11 = scalar_select %p1509_p4, 1, 0 }
  0x13   : > { %s1853_s12 = scalar_select %p1514_p6, 1, 0 }
  0x14   : > { %s1855_s13 = scalar_select %p1519_p8, 1, 0 }
  0x15   : > { %1854 = sst [smem:[#allocation18_spill]] %s1853_s12  ;;  %s249_s15 = sshll.u32 %s1424_s14, 4  ;;  %s1523_s15 = int_to_ptr.vmem [resolvable:$true] %s249_s15 }
  0x16   : > { %p1115_p9 = pneg %p1519_p8  ;;  %s1425_s17 = smov [#allocation8]  }
  0x17   : > { %s265_s18 = sshll.u32 %s1425_s17, 4  ;;  %s1426_s19 = smov [#allocation10]   ;;  %s1534_s18 = int_to_ptr.vmem [resolvable:$true] %s265_s18 }
  0x18   : > { %p1530_p11 = pnand %p1115_p9, %p1842_p1  ;;  %s1536_s20 = sshll.u32 %s1426_s19, 4  ;;  %s282_s20 = int_to_ptr.vmem [resolvable:$true] %s1536_s20 }
  0x19   : > { %s1857_s2 = sld [smem:[#allocation19_spill]] }
  0x1a   : > { %p1546_p13 = pneg %p1530_p11 }
  0x1f   : > { %s1200_s23 = scalar_lea.hbm %s1857_s2, 128 }
  0x20   : > { %p1201_p12 = scmp.ne.s32.totalorder %s1857_s2, %s1200_s23  ;;  %p1207_p5 = scmp.lt.u32.totalorder %s1200_s23, %s1857_s2 }
  0x22   : > { %p1203_p0 = pnand %p1546_p13, %p1201_p12 }
  0x24   : > { %p1204_p3 = pneg %p1203_p0 }
  0x26   : > { %p1209_p7 = pnand %p1207_p5, %p1204_p3 }
  0x28   : > { %1212 = shalt.err (!%p1209_p7)
}
  0x29   : > { %s1213_s17 = scalar_lea.vmem %s1523_s15, 128  ;;  %p1221_p2 = scmp.lt.s32.totalorder %s1523_s15, %s1523_s15 }
  0x2a   : > { %p1214_p9 = scmp.ne.s32.totalorder %s1523_s15, %s1213_s17  ;;  %p1222_p6 = scmp.lt.s32.totalorder %s1213_s17, %s1213_s17 }
  0x2c   : > { %p1216_p10 = pnand %p1214_p9, %p1546_p13  ;;  %p1223_p12 = por %p1222_p6, %p1221_p2 }
  0x2e   : > { %p1217_p1 = pneg %p1216_p10 }
  0x30   : > { %p1224_p0 = pnand %p1223_p12, %p1217_p1 }
  0x32   : > { %1227 = shalt.err (!%p1224_p0)
}
  0x33   : > { %s1427_s19 = smov 64   ;;  %s1428_s21 = smov 4  }
  0x34   : > { %1118 = dma.hbm_to_vmem [thread:$0]  (!%p1530_p11), %s1857_s2, 128, %s1523_s15, [#allocation6], %s1427_s19, %s1427_s19, %s1428_s21  }
  0x35   : > { %s1859_s4 = sld [smem:[#allocation20_spill]] }
  0x3b   : > { %s1228_s10 = scalar_lea.hbm %s1859_s4, 1024 }
  0x3c   : > { %p1229_p1 = scmp.ne.s32.totalorder %s1859_s4, %s1228_s10  ;;  %p1235_p10 = scmp.lt.u32.totalorder %s1228_s10, %s1859_s4 }
  0x3e   : > { %p1231_p2 = pnand %p1229_p1, %p1546_p13 }
  0x40   : > { %p1232_p6 = pneg %p1231_p2 }
  0x42   : > { %p1237_p3 = pnand %p1235_p10, %p1232_p6 }
  0x44   : > { %1240 = shalt.err (!%p1237_p3)
}
  0x45   : > { %s1241_s15 = scalar_lea.vmem %s1534_s18, 1024  ;;  %p1249_p12 = scmp.lt.s32.totalorder %s1534_s18, %s1534_s18 }
  0x46   : > { %p1242_p5 = scmp.ne.s32.totalorder %s1534_s18, %s1241_s15  ;;  %p1250_p0 = scmp.lt.s32.totalorder %s1241_s15, %s1241_s15 }
  0x48   : > { %p1244_p7 = pnand %p1242_p5, %p1546_p13  ;;  %p1251_p1 = por %p1250_p0, %p1249_p12 }
  0x4a   : > { %p1245_p9 = pneg %p1244_p7 }
  0x4c   : > { %p1252_p2 = pnand %p1251_p1, %p1245_p9 }
  0x4e   : > { %1255 = shalt.err (!%p1252_p2)
}
  0x4f   : > { %1121 = dma.hbm_to_vmem [thread:$0]  (!%p1530_p11), %s1859_s4, 1024, %s1534_s18, [#allocation9], %s1427_s19, %s1427_s19, %s1428_s21  }
  0x50   : > { %s1860_s6 = sld [smem:[#allocation21_spill]] }
  0x56   : > { %s1256_s24 = scalar_lea.hbm %s1860_s6, 1024 }
  0x57   : > { %p1257_p6 = scmp.ne.s32.totalorder %s1860_s6, %s1256_s24  ;;  %p1263_p5 = scmp.lt.u32.totalorder %s1256_s24, %s1860_s6 }
  0x59   : > { %p1259_p10 = pnand %p1257_p6, %p1546_p13 }
  0x5b   : > { %p1260_p3 = pneg %p1259_p10 }
  0x5d   : > { %p1265_p7 = pnand %p1263_p5, %p1260_p3 }
  0x5f   : > { %1268 = shalt.err (!%p1265_p7)
}
  0x60   : > { %s1269_s15 = scalar_lea.vmem %s282_s20, 1024  ;;  %p1277_p1 = scmp.lt.s32.totalorder %s282_s20, %s282_s20 }
  0x61   : > { %p1270_p9 = scmp.ne.s32.totalorder %s282_s20, %s1269_s15  ;;  %p1278_p2 = scmp.lt.s32.totalorder %s1269_s15, %s1269_s15 }
  0x63   : > { %p1272_p12 = pnand %p1270_p9, %p1546_p13  ;;  %p1279_p4 = por %p1278_p2, %p1277_p1 }
  0x65   : > { %p1273_p0 = pneg %p1272_p12 }
  0x67   : > { %p1280_p8 = pnand %p1279_p4, %p1273_p0 }
  0x69   : > { %1283 = shalt.err (!%p1280_p8)
}
  0x6a   : > { %1124 = dma.hbm_to_vmem [thread:$0]  (!%p1530_p11), %s1860_s6, 1024, %s282_s20, [#allocation9], %s1427_s19, %s1427_s19, %s1428_s21  }
  0x6b   : > { %s1619_s26 = sadd.s32 1, %s1422_s30   ;;  %s35_s12 = sadd.s32 1, %s1418_s29 }
  0x6c   : > { %s32_s16 = ssub.s32 %s1422_s30, %s1619_s26  ;;  %p42_p8 = scmp.ne.s32.totalorder %s1418_s29, %s1414_s28 }
  0x6d   : > { %p33_p4 = scmp.eq.s32.totalorder %s32_s16, 0  ;;  %p43_p13 = scmp.eq.s32.totalorder %s1422_s30, 0 }
  0x6e   : > { %p1139_p6 = scmp.lt.s32.totalorder %s1422_s30, 2  ;;  %p1861_p3 = scmp.eq.s32.totalorder %s1500_s9, 1 }
  0x6f   : > { %s1629_s22 = scalar_select %p33_p4, %s1418_s29, %s35_s12  }
  0x70   : > { %p44_p10 = por %p43_p13, %p42_p8  ;;  %p1633_p5 = por %p1861_p3, %p42_p8 }
  0x71   : > { %s298_s24 = sand.u32 1, %s1418_s29   ;;  %s969_s25 = sshll.u32 %s1422_s30, 7 }
  0x72   : > { %s1862_s23 = scalar_select %p1633_p5, 1, 0 }
  0x73   : > { %s1639_s20 = sshll.u32 %s298_s24, 3  ;;  %s1644_s10 = scalar_lea.hbm %s1833_s0, %s969_s25 }
  0x74   : > { %s302_s14 = scalar_lea.vmem [#allocation2], %s1639_s20  ;;  %p1647_p11 = pnand %p1139_p6, %p44_p10 }
  0x75   : > { %s309_s17 = sshll.u32 %s302_s14, 4  ;;  %s1656_s16 = scalar_lea.hbm %s1834_s1, %s969_s25  ;;  %s1651_s17 = int_to_ptr.vmem [resolvable:$true] %s309_s17 }
  0x76   : > { %s299_s12 = scalar_lea.sflag [#allocation3], %s298_s24  ;;  %s1284_s19 = scalar_lea.hbm %s1644_s10, 128 }
  0x77   : > { %p1285_p7 = scmp.ne.s32.totalorder %s1644_s10, %s1284_s19  ;;  %p1286_p9 = pneg %p1647_p11 }
  0x78   : > { %s1289_s2 = scalar_lea.hbm %s1833_s0, 256  ;;  %p1290_p1 = scmp.lt.u32.totalorder %s1644_s10, %s1833_s0 }
  0x79   : > { %p1287_p12 = pnand %p1286_p9, %p1285_p7  ;;  %p1291_p2 = scmp.lt.u32.totalorder %s1289_s2, %s1284_s19 }
  0x7a   : > { %p1293_p8 = scmp.lt.u32.totalorder %s1284_s19, %s1644_s10 }
  0x7b   : > { %p1288_p0 = pneg %p1287_p12  ;;  %p1292_p4 = por %p1291_p2, %p1290_p1 }
  0x7d   : > { %p1294_p13 = por %p1293_p8, %p1292_p4 }
  0x7f   : > { %p1295_p6 = pnand %p1294_p13, %p1288_p0 }
  0x81   : > { %1298 = shalt.err (!%p1295_p6)
}
  0x82   : > { %s1299_s24 = scalar_lea.vmem %s1651_s17, 128  ;;  %s1429_s25 = smov [#allocation2]  }
  0x83   : > { %p1300_p10 = scmp.ne.s32.totalorder %s1651_s17, %s1299_s24  ;;  %s1304_s18 = sshll.u32 %s1429_s25, 4  ;;  %s1305_s18 = int_to_ptr.vmem [resolvable:$false] %s1304_s18 }
  0x84   : > { %s1306_s4 = scalar_lea.vmem %s1305_s18, 256  ;;  %p1307_p12 = scmp.lt.s32.totalorder %s1651_s17, %s1305_s18 }
  0x85   : > { %p1302_p3 = pnand %p1300_p10, %p1286_p9  ;;  %p1308_p1 = scmp.lt.s32.totalorder %s1306_s4, %s1299_s24 }
  0x87   : > { %p1303_p7 = pneg %p1302_p3  ;;  %p1309_p2 = por %p1308_p1, %p1307_p12 }
  0x89   : > { %p1310_p4 = pnand %p1309_p2, %p1303_p7 }
  0x8b   : > { %1313 = shalt.err (!%p1310_p4)
}
  0x8c   : > { %1128 = dma.hbm_to_vmem [thread:$0]  (!%p1647_p11), %s1644_s10, 128, %s1651_s17, %s299_s12  }
  0x8d   : > { %s316_s2 = sand.u32 1, %s1422_s30   ;;  %s320_s6 = scalar_lea.vmem [#allocation5], %s1639_s20 }
  0x8e   : > { %s327_s27 = sshll.u32 %s320_s6, 4  ;;  %s317_s19 = scalar_lea.sflag [#allocation6], %s316_s2  ;;  %s328_s27 = int_to_ptr.vmem [resolvable:$true] %s327_s27 }
  0x8f   : > { %s1314_s21 = scalar_lea.hbm %s1656_s16, 128  ;;  %s1319_s25 = scalar_lea.hbm %s1834_s1, 256 }
  0x90   : > { %p1315_p0 = scmp.ne.s32.totalorder %s1656_s16, %s1314_s21  ;;  %p1320_p6 = scmp.lt.u32.totalorder %s1656_s16, %s1834_s1 }
  0x91   : > { %p1321_p10 = scmp.lt.u32.totalorder %s1319_s25, %s1314_s21  ;;  %p1323_p7 = scmp.lt.u32.totalorder %s1314_s21, %s1656_s16 }
  0x92   : > { %p1317_p8 = pnand %p1315_p0, %p1286_p9 }
  0x93   : > { %p1322_p3 = por %p1321_p10, %p1320_p6 }
  0x94   : > { %p1318_p13 = pneg %p1317_p8 }
  0x95   : > { %p1324_p12 = por %p1323_p7, %p1322_p3 }
  0x97   : > { %p1325_p1 = pnand %p1324_p12, %p1318_p13 }
  0x99   : > { %1328 = shalt.err (!%p1325_p1)
}
  0x9a   : > { %s1329_s20 = scalar_lea.vmem %s328_s27, 128  ;;  %s1430_s10 = smov [#allocation5]  }
  0x9b   : > { %p1330_p2 = scmp.ne.s32.totalorder %s328_s27, %s1329_s20  ;;  %s1334_s17 = sshll.u32 %s1430_s10, 4  ;;  %s1335_s17 = int_to_ptr.vmem [resolvable:$false] %s1334_s17 }
  0x9c   : > { %s1336_s12 = scalar_lea.vmem %s1335_s17, 256  ;;  %p1337_p8 = scmp.lt.s32.totalorder %s328_s27, %s1335_s17 }
  0x9d   : > { %p1332_p4 = pnand %p1330_p2, %p1286_p9  ;;  %p1338_p5 = scmp.lt.s32.totalorder %s1336_s12, %s1329_s20 }
  0x9f   : > { %p1333_p0 = pneg %p1332_p4  ;;  %p1339_p6 = por %p1338_p5, %p1337_p8 }
  0xa1   : > { %p1340_p10 = pnand %p1339_p6, %p1333_p0 }
  0xa3   : > { %1343 = shalt.err (!%p1340_p10)
}
  0xa4   : > { %1131 = dma.hbm_to_vmem [thread:$0]  (!%p1647_p11), %s1656_s16, 128, %s328_s27, %s317_s19  }
  0xa5   : > { %p1864_p13 = scmp.ne.s32.totalorder %s1855_s13, 0 }
  0xa6   : > { %s1707_s2 = sand.u32 (!%p1864_p13), 1, %s1414_s28   ;;  %p1865_p5 = scmp.ne.s32.totalorder (!%p1864_p13), %s1852_s11, 0 }
  0xa7   : > { %336 = sbr.rel (%p1864_p13) target bundleno = 1508 (0x5e4), region = 52  ;;  %s1710_s6 = sshll.u32 (!%p1864_p13), %s1707_s2, 3 }
  0xa8   : > { %s339_s21 = scalar_lea.sflag (!%p1864_p13), [#allocation3], %s1707_s2  ;;  %s342_s14 = scalar_lea.vmem (!%p1864_p13), [#allocation2], %s1710_s6 }
  0xae   : > { %1389 = dma.done.wait (%p1865_p5), %s339_s21, 128  }
  0xaf   : > { %1391 = vsyncadd (%p1865_p5), %s339_s21, 4294967168  ;;  %s347_s13 = sand.u32 1, %s1500_s9   ;;  %s351_s16 = scalar_lea.vmem [#allocation5], %s1710_s6 }
  0xb0   : > { %s348_s15 = scalar_lea.sflag [#allocation6], %s347_s13 }
  0xb1   : > { %1393 = dma.done.wait (%p1865_p5), %s348_s15, 128  }
  0xb2   : > { %1395 = vsyncadd (%p1865_p5), %s348_s15, 4294967168  ;;  %p1866_p11 = scmp.eq.s32.totalorder %s1500_s9, 0 }
  0xb4   : > { %1397 = dma.done.wait (%p1866_p11), [#allocation6], 128   ;;  %p1867_p9 = pmov %p1866_p11 }
  0xb6   : > { %1399 = vsyncadd (%p1867_p9), [#allocation6], 4294967168  ;;  %p1868_p3 = pmov %p1867_p9 }
  0xb8   : > { %1401 = dma.done.wait (%p1868_p3), [#allocation9], 2048   ;;  %p1869_p7 = pmov %p1868_p3 }
  0xb9   : > { %v1431_v0 = vmov 0.0   ;;  %vm1432_vm0 = vmmov 0   ;;  %v404_v1 = vld [vmem:[%s342_s14] sm:$0xff]  ;;  %vm410_vm1 = vcmask 1043456   ;;  %v402_v2 = vld [vmem:[%s351_s16] sm:$0xff]  ;;  %vm406_vm2 = vcmask 64512  }
  0xba   : > { %1403 = vsyncadd (%p1869_p7), [#allocation9], 4294965248  ;;  %1033 = vmatprep.subr.bf16.mxu1 %v1431_v0  ;;  %1035 = vmatprep.mubr.msk.bf16.mxu1 %vm1432_vm0, %v1431_v0  ;;  %v405_v3 = vpack.c.bf16 %v404_v1, %v404_v1  ;;  %v1739_v5 = vpack.c.bf16 %v402_v2, %v402_v2  ;;  %v1183_v6 = vld [vmem:[#allocation7] sm:$0xff]   ;;  %vm470_vm3 = vcmask 130048   ;;  %v1184_v13 = vld [vmem:[#allocation8] sm:$0xff]   ;;  %s1004_s4 = sshll.u32 %s1500_s9, 7 }
  0xbb   : > { %1045 = vmatprep.subr.bf16.mxu0 %v1431_v0  ;;  %1047 = vmatprep.mubr.msk.bf16.mxu0 %vm1432_vm0, %v1431_v0  ;;  %v1185_v14 = vld [vmem:[#allocation8 + $0x8] sm:$0xff]   ;;  %v1186_v15 = vld [vmem:[#allocation8 + $0x10] sm:$0xff]   ;;  %v1187_v16 = vld [vmem:[#allocation8 + $0x18] sm:$0xff]   ;;  %s400_s20 = scalar_lea.vmem [#allocation11], %s1710_s6  ;;  %s1789_s21 = scalar_lea.hbm %s1841_s8, %s1004_s4 }
  0xbc   : > { %v412_v4 = vsel %vm410_vm1, %v405_v3, 0  ;;  %v1188_v17 = vld [vmem:[#allocation8 + $0x20] sm:$0xff]   ;;  %v1189_v18 = vld [vmem:[#allocation8 + $0x28] sm:$0xff]   ;;  %v1190_v19 = vld [vmem:[#allocation8 + $0x30] sm:$0xff]   ;;  %s841_s10 = sshll.u32 %s400_s20, 4  ;;  %s828_s14 = scalar_lea.sflag [#allocation4], %s1707_s2  ;;  %s1791_s10 = int_to_ptr.vmem [resolvable:$true] %s841_s10 }
  0xbd   : > { %1034 = vmatpush3.bf16.msra.mxu1 %v412_v4  ;;  %v980_v20 = vld [vmem:[%s1836_s3] ss:$0 sm:$0xff]  ;;  %v1192_v43 = vld [vmem:[#allocation10] sm:$0xff]   ;;  %v1193_v44 = vld [vmem:[#allocation10 + $0x8] sm:$0xff]   ;;  %s1344_s9 = scalar_lea.vmem %s1791_s10, 128  ;;  %p1870_p1 = scmp.ne.s32.totalorder %s1862_s23, 0 }
  0xbe   : > { %1039 = vmatprep.subr.bf16.mxu1 %v1431_v0  ;;  %v1191_v28 = vld [vmem:[#allocation8 + $0x38] sm:$0xff]   ;;  %v1194_v45 = vld [vmem:[#allocation10 + $0x10] sm:$0xff]   ;;  %v1196_v47 = vld [vmem:[#allocation10 + $0x20] sm:$0xff]   ;;  %p1345_p12 = scmp.ne.s32.totalorder %s1791_s10, %s1344_s9  ;;  %s1433_s6 = smov [#allocation11]  }
  0xbf   : > { %v984_v35 = vld [vmem:[%s1838_s5] ss:$0 sm:$0xff]  ;;  %v1197_v48 = vld [vmem:[#allocation10 + $0x28] sm:$0xff]   ;;  %v1198_v49 = vld [vmem:[#allocation10 + $0x30] sm:$0xff]   ;;  %s1348_s13 = sshll.u32 %s1433_s6, 4  ;;  %s1349_s13 = int_to_ptr.vmem [resolvable:$false] %s1348_s13 }
  0xc0   : > { %1036 = vmatmul.mubr.msk.bf16.vlgmr.msra.gmra.mrb[0].mxu1 %vm406_vm2, %v1739_v5  ;;  %v1195_v46 = vld [vmem:[#allocation10 + $0x18] sm:$0xff]   ;;  %p1346_p2 = pnand %p1345_p12, %p1870_p1  ;;  %s1350_s15 = scalar_lea.vmem %s1349_s13, 256 }
  0xc1   : > { %1041 = vmatprep.mubr.msk.bf16.mxu1 %vm1432_vm0, %v1431_v0  ;;  %1040 = vmatpush3.bf16.msra.mxu1 %v1183_v6  ;;  %v1199_v50 = vld [vmem:[#allocation10 + $0x38] sm:$0xff]   ;;  %p1351_p0 = scmp.lt.s32.totalorder %s1791_s10, %s1349_s13  ;;  %p1352_p8 = scmp.lt.s32.totalorder %s1350_s15, %s1344_s9 }
  0xc2   : > { %1051 = vmatprep.subr.bf16.mxu1 %v1431_v0  ;;  %v994_v57 = vld [vmem:[%s1840_s7] ss:$0 sm:$0xff]  ;;  %p1347_p4 = pneg %p1346_p2 }
  0xc3   : > { %p1353_p6 = por %p1352_p8, %p1351_p0 }
  0xc5   : > { %p1354_p10 = pnand %p1353_p6, %p1347_p4 }
 0x193   : > { %v448_v7 = vpop.f32.mrb[0].mxu1 }
 0x194   : > { %v449_v8 = vadd.f32 %v448_v7, %v404_v1  ;;  %v1037_v9 = vpop.f32.mrb[1].mxu1 }
 0x195   : > { %v451_v10 = vpop.f32.mrb[2].mxu1 }
 0x196   : > { %v454_v11 = vpack.c.bf16 %v449_v8, %v449_v8  ;;  %v1038_v12 = vpop.f32.mrb[3].mxu1 }
 0x198   : > { %1042 = vmatmul.mubr.msk.bf16.vlgmr.msra.gmra.mrb[4].mxu1 %vm470_vm3, %v454_v11 }
 0x199   : > { %1067 = vmatprep.mubr.msk.bf16.mxu1 %vm1432_vm0, %v1431_v0  ;;  %1052 = vmatpush3.bf16.msra.mxu1 %v1184_v13 }
 0x19a   : > { %1053 = vmatprep.subr.bf16.mxu1 %v1431_v0 }
 0x19d   : > { %1054 = vmatpush3.bf16.msra.mxu1 %v1185_v14 }
 0x19e   : > { %1055 = vmatprep.subr.bf16.mxu1 %v1431_v0 }
 0x1a1   : > { %1056 = vmatpush3.bf16.msra.mxu1 %v1186_v15 }
 0x1a2   : > { %1057 = vmatprep.subr.bf16.mxu1 %v1431_v0 }
 0x1a5   : > { %1058 = vmatpush3.bf16.msra.mxu1 %v1187_v16 }
 0x1a6   : > { %1059 = vmatprep.subr.bf16.mxu1 %v1431_v0 }
 0x1a9   : > { %1060 = vmatpush3.bf16.msra.mxu1 %v1188_v17 }
 0x1aa   : > { %1061 = vmatprep.subr.bf16.mxu1 %v1431_v0 }
 0x1ad   : > { %1062 = vmatpush3.bf16.msra.mxu1 %v1189_v18 }
 0x1ae   : > { %1063 = vmatprep.subr.bf16.mxu1 %v1431_v0 }
 0x1b1   : > { %1064 = vmatpush3.bf16.msra.mxu1 %v1190_v19 }
 0x1b2   : > { %1065 = vmatprep.subr.bf16.mxu1 %v1431_v0 }
 0x1b5   : > { %1066 = vmatpush3.bf16.msra.mxu1 %v1191_v28 }
 0x26b   : > { %v508_v21 = vpop.f32.mrb[4].mxu1 }
 0x26c   : > { %v509_v22 = vadd.f32 %v980_v20, %v508_v21  ;;  %v1043_v23 = vpop.f32.mrb[5].mxu1 }
 0x26d   : > { %v511_v24 = vpop.f32.mrb[6].mxu1 }
 0x26e   : > { %v1044_v25 = vpop.f32.mrb[7].mxu1  ;;  %v514_v26 = vpack.c.bf16 %v509_v22, %v509_v22 }
 0x270   : > { %v516_v27 = vsel %vm410_vm1, %v514_v26, 0 }
 0x271   : > { %1046 = vmatpush3.bf16.msra.mxu0 %v516_v27 }
 0x272   : > { %1071 = vmatprep.subr.bf16.mxu0 %v1431_v0 }
 0x274   : > { %1048 = vmatmul.mubr.msk.bf16.vlgmr.msra.gmra.mrb[0].mxu0 %vm406_vm2, %v1739_v5 }
 0x275   : > { %1073 = vmatprep.mubr.msk.bf16.mxu0 %vm1432_vm0, %v1431_v0 }
 0x347   : > { %v552_v29 = vpop.f32.mrb[0].mxu0 }
 0x348   : > { %v553_v30 = vadd.f32 %v552_v29, %v509_v22  ;;  %v1049_v31 = vpop.f32.mrb[1].mxu0 }
 0x349   : > { %v555_v32 = vpop.f32.mrb[2].mxu0 }
 0x34a   : > { %v558_v33 = vpack.c.bf16 %v553_v30, %v553_v30  ;;  %v1050_v34 = vpop.f32.mrb[3].mxu0 }
 0x34c   : > { %1068 = vmatmul.mubr.bf16.vlgmr.msra.gmra.mrb[8].mxu1 %v558_v33 }
 0x41f   : > { %v664_v36 = vpop.f32.mrb[8].mxu1 }
 0x420   : > { %v665_v37 = vadd.f32 %v984_v35, %v664_v36  ;;  %v1069_v38 = vpop.f32.mrb[9].mxu1 }
 0x421   : > { %v667_v39 = vpop.f32.mrb[10].mxu1 }
 0x422   : > { %v670_v40 = vpack.c.bf16 %v665_v37, %v665_v37  ;;  %v1070_v41 = vpop.f32.mrb[11].mxu1 }
 0x424   : > { %v672_v42 = vsel %vm410_vm1, %v670_v40, 0 }
 0x425   : > { %1072 = vmatpush3.bf16.msra.mxu0 %v672_v42 }
 0x426   : > { %1077 = vmatprep.subr.bf16.mxu0 %v1431_v0 }
 0x428   : > { %1074 = vmatmul.mubr.msk.bf16.vlgmr.msra.gmra.mrb[4].mxu0 %vm406_vm2, %v1739_v5 }
 0x429   : > { %1078 = vmatpush3.bf16.msra.mxu0 %v1192_v43  ;;  %1093 = vmatprep.mubr.msk.bf16.mxu0 %vm1432_vm0, %v1431_v0 }
 0x42a   : > { %1079 = vmatprep.subr.bf16.mxu0 %v1431_v0 }
 0x42d   : > { %1080 = vmatpush3.bf16.msra.mxu0 %v1193_v44 }
 0x42e   : > { %1081 = vmatprep.subr.bf16.mxu0 %v1431_v0 }
 0x431   : > { %1082 = vmatpush3.bf16.msra.mxu0 %v1194_v45 }
 0x432   : > { %1083 = vmatprep.subr.bf16.mxu0 %v1431_v0 }
 0x435   : > { %1084 = vmatpush3.bf16.msra.mxu0 %v1195_v46 }
 0x436   : > { %1085 = vmatprep.subr.bf16.mxu0 %v1431_v0 }
 0x439   : > { %1086 = vmatpush3.bf16.msra.mxu0 %v1196_v47 }
 0x43a   : > { %1087 = vmatprep.subr.bf16.mxu0 %v1431_v0 }
 0x43d   : > { %1088 = vmatpush3.bf16.msra.mxu0 %v1197_v48 }
 0x43e   : > { %1089 = vmatprep.subr.bf16.mxu0 %v1431_v0 }
 0x441   : > { %1090 = vmatpush3.bf16.msra.mxu0 %v1198_v49 }
 0x442   : > { %1091 = vmatprep.subr.bf16.mxu0 %v1431_v0 }
 0x445   : > { %1092 = vmatpush3.bf16.msra.mxu0 %v1199_v50 }
 0x4fb   : > { %v708_v51 = vpop.f32.mrb[4].mxu0 }
 0x4fc   : > { %v709_v52 = vadd.f32 %v708_v51, %v665_v37  ;;  %v1075_v53 = vpop.f32.mrb[5].mxu0 }
 0x4fd   : > { %v711_v54 = vpop.f32.mrb[6].mxu0 }
 0x4fe   : > { %v714_v55 = vpack.c.bf16 %v709_v52, %v709_v52  ;;  %v1076_v56 = vpop.f32.mrb[7].mxu0 }
 0x500   : > { %1094 = vmatmul.mubr.bf16.vlgmr.msra.gmra.mrb[8].mxu0 %v714_v55 }
 0x5d3   : > { %v820_v58 = vpop.f32.mrb[8].mxu0 }
 0x5d4   : > { %v821_v59 = vadd.f32 %v994_v57, %v820_v58  ;;  %v1095_v60 = vpop.f32.mrb[9].mxu0 }
 0x5d5   : > { %v823_v61 = vpop.f32.mrb[10].mxu0 }
 0x5d6   : > { %826 = vst [vmem:[%s400_s20] sm:$0xff] %v821_v59  ;;  %v1096_v62 = vpop.f32.mrb[11].mxu0 }
 0x5d7   : > { %1357 = shalt.err (!%p1354_p10)
}
 0x5d8   : > { %s1358_s2 = scalar_lea.hbm %s1789_s21, 128  ;;  %s1362_s27 = scalar_lea.hbm %s1841_s8, 256 }
 0x5d9   : > { %p1359_p13 = scmp.ne.s32.totalorder %s1789_s21, %s1358_s2  ;;  %p1363_p9 = scmp.lt.u32.totalorder %s1789_s21, %s1841_s8 }
 0x5da   : > { %p1364_p3 = scmp.lt.u32.totalorder %s1362_s27, %s1358_s2  ;;  %p1366_p12 = scmp.lt.u32.totalorder %s1358_s2, %s1789_s21 }
 0x5db   : > { %p1360_p5 = pnand %p1359_p13, %p1870_p1 }
 0x5dc   : > { %p1365_p7 = por %p1364_p3, %p1363_p9 }
 0x5dd   : > { %p1361_p11 = pneg %p1360_p5 }
 0x5de   : > { %p1367_p2 = por %p1366_p12, %p1365_p7 }
 0x5e0   : > { %p1368_p4 = pnand %p1367_p2, %p1361_p11 }
 0x5e2   : > { %1371 = shalt.err (!%p1368_p4)
}
 0x5e3   : > { %1113 = dma.vmem_to_hbm [thread:$0]  (%p1870_p1), %s1791_s10, 128, %s1789_s21, %s828_s14  }
 0x5e4 PF: > { %s1871_s25 = sld [smem:[#allocation17_spill]]  ;;  %s1872_s18 = sld [smem:[#allocation18_spill]] }
 0x5e5   : > { %p1874_p8 = scmp.ge.s32.totalorder %s1422_s30, 2 }
 0x5ea   : > { %s853_s4 = sand.u32 1, %s1871_s25   ;;  %p1873_p0 = scmp.ne.s32.totalorder %s1872_s18, 0 }
 0x5eb   : > { %s854_s20 = scalar_lea.sflag [#allocation4], %s853_s4 }
 0x5ec   : > { %p1133_p6 = pnand %p1874_p8, %p1873_p0 }
 0x5ee   : > { %1405 = dma.done.wait (!%p1133_p6), %s854_s20, 128  }
 0x5ef   : > { %1407 = vsyncadd (!%p1133_p6), %s854_s20, 4294967168  ;;  %p25_p10 = scmp.ge.s32.totalorder %s1619_s26, 4   ;;  %s1875_s27 = smov %s1414_s28 }
 0x5f0   : > { %s1876_s28 = smov %s1418_s29  ;;  %s1877_s29 = smov %s1629_s22 }
 0x5f1   : > { %s1878_s30 = smov %s1619_s26  ;;  %27 = sbr.rel (!%p25_p10) target bundleno = 12 (0xc), region = 122 }
 0x5f8   :  { %859 = vsyncpa [#allocation3], 1 }
 0x5f9   :  { %861 = vsyncpa [#allocation3 + $0x1], 1 }
 0x5fa   :  { %862 = vsyncpa [#allocation6], 1 }
 0x5fb   :  { %864 = vsyncpa [#allocation6 + $0x1], 1 }
 0x5fc   :  { %865 = vsyncpa [#allocation9], 1 }
 0x5fd   :  { %866 = vsyncpa [#allocation4], 1 }
 0x5fe   :  { %868 = vsyncpa [#allocation4 + $0x1], 1 }

</bundles_post_ra>
